<compile_context>
chip_gen: v7x
topology: tpu7x:2x2x1
jax: 0.10.0
libtpu: 0.0.40
codegen_flags: <defaults>
</compile_context>

<pallas_src>
import jax
import jax.numpy as jnp
from jax.experimental import pallas as pl
from jax.experimental.pallas import tpu as pltpu


def _generator_kernel(x_ref, p_ref, o_ref):
    # x_ref: (TM, D) row tile; p_ref: (D+3, D) param slab (W^T / bias / gamma / beta);
    # o_ref: (TM, D).
    d = x_ref.shape[-1]
    x = x_ref[...]                                   # (TM, D)

    # Static slices into the parameter slab (sublane-aligned loads).
    w_t = p_ref[0:d, :]                              # (D, D) pre-transposed weight
    tail = p_ref[d:d + 3, :]                         # (3, D): bias, gamma, beta
    bias = tail[0:1, :]
    gamma = tail[1:2, :]
    beta = tail[2:3, :]

    # Linear (MXU). f32 + HIGHEST precision for parity with the f32 torch module.
    y = jnp.dot(x, w_t, preferred_element_type=jnp.float32,
                precision=jax.lax.Precision.HIGHEST) + bias

    # LayerNorm over last dim (torch defaults: biased variance, eps=1e-5).
    mean = jnp.mean(y, axis=-1, keepdims=True)
    yc = y - mean
    var = jnp.mean(yc * yc, axis=-1, keepdims=True)
    inv_std = jax.lax.rsqrt(var + 1e-5)              # EUP
    ln = yc * inv_std * gamma + beta

    # Numerically stable log_softmax over last dim.
    z = ln - jnp.max(ln, axis=-1, keepdims=True)
    lse = jnp.log(jnp.sum(jnp.exp(z), axis=-1, keepdims=True))   # exp/log on EUP
    o_ref[...] = (z - lse).astype(o_ref.dtype)


def generator_forward(x, w, b, gamma, beta, *, tile_m=8192):
    """x: (..., D) float32. w: torch layout (out, in) = (D, D); b/gamma/beta: (D,)."""
    orig_shape = x.shape
    D = orig_shape[-1]
    M = x.size // D

    # Wrapper-side glue: flatten leading dims; pack all params into one slab so the
    # kernel issues 2 input DMAs instead of 5.
    x2d = x.reshape(M, D)
    params = jnp.concatenate(
        [w.T, b.reshape(1, D), gamma.reshape(1, D), beta.reshape(1, D)], axis=0
    )  # (D+3, D): rows [0,D)=W^T, D=bias, D+1=gamma, D+2=beta

    if M <= tile_m:
        tm = M                      # single-shot: block == full array (always legal)
    else:
        tm = (tile_m // 8) * 8      # tiled path: sublane dim must be a multiple of 8
    grid_m = pl.cdiv(M, tm)         # last tile may be partial; writeback is masked

    cost = pl.CostEstimate(
        flops=2 * M * D * D + 12 * M * D,            # matmul + LN/softmax elementwise
        transcendentals=M * (D + 3),                 # exp per element + log/rsqrt per row
        bytes_accessed=4 * (2 * M * D + (D + 3) * D),
    )

    out2d = pl.pallas_call(
        _generator_kernel,
        out_shape=jax.ShapeDtypeStruct((M, D), x.dtype),
        grid=(grid_m,),
        in_specs=[
            pl.BlockSpec((tm, D), lambda i: (i, 0)),       # x row tile (streams HBM)
            pl.BlockSpec((D + 3, D), lambda i: (0, 0)),    # invariant param slab
        ],
        out_specs=pl.BlockSpec((tm, D), lambda i: (i, 0)),
        compiler_params=pltpu.CompilerParams(
            dimension_semantics=("parallel",)),            # v7x: 2 TCs split the rows
        cost_estimate=cost,
    )(x2d, params)

    return out2d.reshape(orig_shape)


def _reference(x, w, b, gamma, beta, eps=1e-5):
    y = jnp.matmul(x, w.T, precision=jax.lax.Precision.HIGHEST) + b
    mean = jnp.mean(y, axis=-1, keepdims=True)
    var = jnp.mean(jnp.square(y - mean), axis=-1, keepdims=True)
    ln = (y - mean) / jnp.sqrt(var + eps) * gamma + beta
    return jax.nn.log_softmax(ln, axis=-1)


if __name__ == "__main__":
    D = 32  # input_dim / hidden

    key = jax.random.PRNGKey(0)
    kx, kw, kb, kg, kbt, kx2 = jax.random.split(key, 6)

    # nn.Linear(D, D): weight (D, D) torch-layout (out, in), bias (D,)
    bound = 1.0 / jnp.sqrt(jnp.float32(D))
    w = jax.random.uniform(kw, (D, D), jnp.float32, -bound, bound)
    b = jax.random.uniform(kb, (D,), jnp.float32, -bound, bound)
    # LayerNorm affine params (perturbed from the 1/0 init so the affine path is tested)
    gamma = 1.0 + 0.1 * jax.random.normal(kg, (D,), dtype=jnp.float32)
    beta = 0.1 * jax.random.normal(kbt, (D,), dtype=jnp.float32)

    # 1) Module-shaped demo: batch=2, tokens=8, hidden=32 (single-shot path).
    B, N = 2, 8
    x = jax.random.normal(kx, (B, N, D), dtype=jnp.float32)
    out = jax.block_until_ready(generator_forward(x, w, b, gamma, beta))
    ref = _reference(x, w, b, gamma, beta)
    assert out.shape == (B, N, D)
    assert jnp.allclose(out, ref, atol=1e-4, rtol=1e-4), "small-shape mismatch"
    assert jnp.allclose(jnp.sum(jnp.exp(out), axis=-1), 1.0, atol=1e-4)

    # 2) Tiled large-M path: M=1280 rows with tile_m=512 -> grid=(3,), last tile
    #    partial, exercising the multi-step 'parallel' grid and masked writeback.
    x_big = jax.random.normal(kx2, (2, 640, D), dtype=jnp.float32)
    out_big = jax.block_until_ready(
        generator_forward(x_big, w, b, gamma, beta, tile_m=512))
    ref_big = _reference(x_big, w, b, gamma, beta)
    assert jnp.allclose(out_big, ref_big, atol=1e-4, rtol=1e-4), "tiled-path mismatch"

    print("KERNEL_OK")
</pallas_src>

<mosaic_0001>
module attributes {stable_mosaic.version = 11 : i64} {
  func.func @_generator_kernel(%arg0: i32, %arg1: memref<16x32xf32, #tpu.memory_space<vmem>>, %arg2: memref<35x32xf32, #tpu.memory_space<vmem>>, %arg3: memref<16x32xf32, #tpu.memory_space<vmem>>) attributes {dimension_semantics = [#tpu.dimension_semantics<parallel>], iteration_bounds = array<i64: 1>, scalar_prefetch = 0 : i64, scratch_operands = 0 : i64, tpu.core_type = #tpu.core_type<tc>, window_params = [{transform_indices = @transform_0, window_bounds = array<i64: 16, 32>}, {pipeline_mode = #tpu.pipeline_mode<synchronous>, transform_indices = @transform_1, window_bounds = array<i64: 35, 32>}, {transform_indices = @transform_2, window_bounds = array<i64: 16, 32>}]} {
    %c0 = arith.constant 0 : index
    %c0_0 = arith.constant 0 : index
    %0 = vector.load %arg1[%c0, %c0_0] : memref<16x32xf32, #tpu.memory_space<vmem>>, vector<16x32xf32>
    %c0_1 = arith.constant 0 : index
    %c0_2 = arith.constant 0 : index
    %1 = vector.load %arg2[%c0_1, %c0_2] : memref<35x32xf32, #tpu.memory_space<vmem>>, vector<32x32xf32>
    %c32 = arith.constant 32 : index
    %c0_3 = arith.constant 0 : index
    %2 = vector.load %arg2[%c32, %c0_3] : memref<35x32xf32, #tpu.memory_space<vmem>>, vector<3x32xf32>
    %3 = vector.extract_strided_slice %2 {offsets = [0, 0], sizes = [1, 32], strides = [1, 1]} : vector<3x32xf32> to vector<1x32xf32>
    %4 = vector.extract_strided_slice %2 {offsets = [1, 0], sizes = [1, 32], strides = [1, 1]} : vector<3x32xf32> to vector<1x32xf32>
    %5 = vector.extract_strided_slice %2 {offsets = [2, 0], sizes = [1, 32], strides = [1, 1]} : vector<3x32xf32> to vector<1x32xf32>
    %cst = arith.constant dense<0.000000e+00> : vector<16x32xf32>
    %6 = tpu.matmul %0, %1, %cst {dimension_numbers = #tpu.dot_dimension_numbers<[1], [0], [0], [1], [0, 0, 1, 1], [], []>, precision = #tpu.contract_precision<fp32>} : vector<16x32xf32>, vector<32x32xf32>, vector<16x32xf32> -> vector<16x32xf32>
    %7 = vector.broadcast %3 : vector<1x32xf32> to vector<16x32xf32>
    %8 = arith.addf %6, %7 : vector<16x32xf32>
    %cst_4 = arith.constant dense<0.000000e+00> : vector<16xf32>
    %9 = vector.multi_reduction <add>, %8, %cst_4 [1] : vector<16x32xf32> to vector<16xf32>
    %10 = vector.shape_cast %9 : vector<16xf32> to vector<16x1xf32>
    %cst_5 = arith.constant 3.200000e+01 : f32
    %11 = vector.broadcast %cst_5 : f32 to vector<16x1xf32>
    %12 = arith.divf %10, %11 : vector<16x1xf32>
    %13 = vector.broadcast %12 : vector<16x1xf32> to vector<16x32xf32>
    %14 = arith.subf %8, %13 : vector<16x32xf32>
    %15 = arith.mulf %14, %14 : vector<16x32xf32>
    %cst_6 = arith.constant dense<0.000000e+00> : vector<16xf32>
    %16 = vector.multi_reduction <add>, %15, %cst_6 [1] : vector<16x32xf32> to vector<16xf32>
    %17 = vector.shape_cast %16 : vector<16xf32> to vector<16x1xf32>
    %cst_7 = arith.constant 3.200000e+01 : f32
    %18 = vector.broadcast %cst_7 : f32 to vector<16x1xf32>
    %19 = arith.divf %17, %18 : vector<16x1xf32>
    %cst_8 = arith.constant 9.99999974E-6 : f32
    %20 = vector.broadcast %cst_8 : f32 to vector<16x1xf32>
    %21 = arith.addf %19, %20 : vector<16x1xf32>
    %22 = math.rsqrt %21 : vector<16x1xf32>
    %23 = vector.broadcast %22 : vector<16x1xf32> to vector<16x32xf32>
    %24 = arith.mulf %14, %23 : vector<16x32xf32>
    %25 = vector.broadcast %4 : vector<1x32xf32> to vector<16x32xf32>
    %26 = arith.mulf %24, %25 : vector<16x32xf32>
    %27 = vector.broadcast %5 : vector<1x32xf32> to vector<16x32xf32>
    %28 = arith.addf %26, %27 : vector<16x32xf32>
    %cst_9 = arith.constant dense<0xFF800000> : vector<16xf32>
    %29 = vector.multi_reduction <maximumf>, %28, %cst_9 [1] : vector<16x32xf32> to vector<16xf32>
    %30 = vector.shape_cast %29 : vector<16xf32> to vector<16x1xf32>
    %31 = vector.broadcast %30 : vector<16x1xf32> to vector<16x32xf32>
    %32 = arith.subf %28, %31 : vector<16x32xf32>
    %33 = math.exp %32 : vector<16x32xf32>
    %cst_10 = arith.constant dense<0.000000e+00> : vector<16xf32>
    %34 = vector.multi_reduction <add>, %33, %cst_10 [1] : vector<16x32xf32> to vector<16xf32>
    %35 = vector.shape_cast %34 : vector<16xf32> to vector<16x1xf32>
    %36 = math.log %35 : vector<16x1xf32>
    %37 = vector.broadcast %36 : vector<16x1xf32> to vector<16x32xf32>
    %38 = arith.subf %32, %37 : vector<16x32xf32>
    %c0_11 = arith.constant 0 : index
    %c0_12 = arith.constant 0 : index
    %39 = vector.load %arg3[%c0_11, %c0_12] : memref<16x32xf32, #tpu.memory_space<vmem>>, vector<16x32xf32>
    tpu.vector_store %arg3[%c0_11, %c0_12], %38 {strides = array<i32>} : memref<16x32xf32, #tpu.memory_space<vmem>>, vector<16x32xf32>,
    return
  }
  func.func @transform_0(%arg0: i32) -> (i32, i32) {
    %c0_i32 = arith.constant 0 : i32
    %c0_i32_0 = arith.constant 0 : i32
    return %arg0, %c0_i32 : i32, i32
  }
  func.func @transform_1(%arg0: i32) -> (i32, i32) {
    %c0_i32 = arith.constant 0 : i32
    %c0_i32_0 = arith.constant 0 : i32
    %c0_i32_1 = arith.constant 0 : i32
    return %c0_i32, %c0_i32_0 : i32, i32
  }
  func.func @transform_2(%arg0: i32) -> (i32, i32) {
    %c0_i32 = arith.constant 0 : i32
    %c0_i32_0 = arith.constant 0 : i32
    return %arg0, %c0_i32 : i32, i32
  }
}

</mosaic_0001>

<bundles_post_ra>
// kernel: tpu_custom_call.1
= control target key start
LH: loop header
LB: loop body
LE: loop exit
PB: predicated region body
PF: predicated region fallthrough
CT: control target
= control target key end

     0   :  { %vm23_vm0 = vcmask 261120   ;;  %s915_s0 = inlined_call_operand.vmem [shape: f32[16,32], index: 0, kind: input, shape index: {}]   ;;  %s916_s1 = inlined_call_operand.vmem [shape: f32[35,32], index: 1, kind: input, shape index: {}]   ;;  %s917_s2 = inlined_call_operand.hbm [shape: f32[16,32], index: 2, kind: output, shape index: {}]  }
   0x1   :  { %v14_v0 = vld [vmem:[%s916_s1] sm:$0xff]  ;;  %v15_v1 = vld [vmem:[%s916_s1 + $0x8] sm:$0xff]  ;;  %v16_v2 = vld [vmem:[%s916_s1 + $0x10] sm:$0xff] }
   0x2   :  { %v31_v3 = vand.u32 4294901760, %v14_v0  ;;  %v34_v4 = vand.u32 4294901760, %v15_v1  ;;  %v17_v5 = vld [vmem:[%s916_s1 + $0x18] sm:$0xff]  ;;  %v37_v6 = vand.u32 4294901760, %v16_v2  ;;  %v12_v7 = vld [vmem:[%s915_s0] sm:$0xff]  ;;  %v13_v8 = vld [vmem:[%s915_s0 + $0x8] sm:$0xff] }
   0x3   :  { %v40_v9 = vand.u32 4294901760, %v17_v5  ;;  %v25_v10 = vsel %vm23_vm0, %v12_v7, 0  ;;  %v28_v11 = vsel %vm23_vm0, %v13_v8, 0 }
   0x4   :  { %v741_v12 = vpack.c.bf16 %v34_v4, %v31_v3  ;;  %v878_v13 = vand.u32 4294901760, %v25_v10  ;;  %v880_v14 = vand.u32 4294901760, %v28_v11  ;;  %v121_v15 = vsub.f32 %v14_v0, %v31_v3 }
   0x5   :  { %7 = vsyncpa [#allocation3], 0  ;;  %v745_v16 = vpack.c.bf16 %v40_v9, %v37_v6  ;;  %v128_v17 = vsub.f32 %v15_v1, %v34_v4  ;;  %v135_v18 = vsub.f32 %v16_v2, %v37_v6  ;;  %v142_v19 = vsub.f32 %v17_v5, %v40_v9  ;;  %v18_v49 = vld [vmem:[%s916_s1 + $0x20] sm:$0x7]  ;;  %s840_s1 = smov [#allocation2]  }
   0x6   :  { %742 = vmatprep.subr.bf16.mxu1 %v741_v12  ;;  %766 = vmatprep.subr.bf16.mxu0 %v741_v12  ;;  %v100_v20 = vsub.f32 %v25_v10, %v878_v13  ;;  %v110_v21 = vsub.f32 %v28_v11, %v880_v14  ;;  %v122_v22 = vand.u32 4294901760, %v121_v15  ;;  %v19_v46 = vlaneseq  ;;  %s628_s22 = sshll.u32 %s840_s1, 4  ;;  %s629_s22 = int_to_ptr.vmem [resolvable:$true] %s628_s22 }
   0x7   :  { %744 = vmatpush3.bf16.msra.mxu1 %v741_v12  ;;  %768 = vmatpush3.bf16.msra.mxu0 %v741_v12  ;;  %v129_v23 = vand.u32 4294901760, %v128_v17  ;;  %v136_v24 = vand.u32 4294901760, %v135_v18  ;;  %v143_v25 = vand.u32 4294901760, %v142_v19  ;;  %v757_v44 = vpack.c.bf16 %v128_v17, %v121_v15  ;;  %s816_s23 = scalar_lea.vmem %s629_s22, 256  ;;  %p821_p1 = scmp.lt.s32.totalorder %s629_s22, %s629_s22 }
   0x8   :  { %746 = vmatprep.subr.bf16.mxu1 %v745_v16  ;;  %770 = vmatprep.subr.bf16.mxu0 %v745_v16  ;;  %v101_v26 = vand.u32 4294901760, %v100_v20  ;;  %v111_v27 = vand.u32 4294901760, %v110_v21  ;;  %v123_v28 = vsub.f32 %v121_v15, %v122_v22  ;;  %v761_v45 = vpack.c.bf16 %v142_v19, %v135_v18  ;;  %p817_p0 = scmp.ne.s32.totalorder %s629_s22, %s816_s23  ;;  %p822_p2 = scmp.lt.s32.totalorder %s816_s23, %s816_s23 }
   0x9   :  { %v130_v29 = vsub.f32 %v128_v17, %v129_v23  ;;  %v773_v30 = vpack.c.bf16 %v129_v23, %v122_v22  ;;  %v137_v31 = vsub.f32 %v135_v18, %v136_v24  ;;  %v144_v32 = vsub.f32 %v142_v19, %v143_v25 }
   0xa   :  { %v102_v33 = vsub.f32 %v100_v20, %v101_v26  ;;  %716 = vmatprep.mubr.f32.mxu0 %v101_v26  ;;  %v112_v34 = vsub.f32 %v110_v21, %v111_v27  ;;  %v124_v35 = vand.u32 4294901760, %v123_v28  ;;  %v777_v43 = vpack.c.bf16 %v143_v25, %v136_v24  ;;  %p823_p3 = por %p822_p2, %p821_p1 }
   0xb   :  { %748 = vmatpush3.bf16.msra.mxu1 %v745_v16  ;;  %772 = vmatpush3.bf16.msra.mxu0 %v745_v16  ;;  %v131_v36 = vand.u32 4294901760, %v130_v29  ;;  %v138_v37 = vand.u32 4294901760, %v137_v31  ;;  %v145_v38 = vand.u32 4294901760, %v144_v32  ;;  %v20_v47 = vshrl.u32 %v19_v46, 7 }
   0xc   :  { %v103_v39 = vand.u32 4294901760, %v102_v33  ;;  %v113_v40 = vand.u32 4294901760, %v112_v34  ;;  %774 = vmatprep.subr.bf16.mxu0 %v773_v30  ;;  %p824_p4 = pnand %p823_p3, %p817_p0 }
   0xd   :  { %v749_v41 = vpack.c.bf16 %v131_v36, %v124_v35  ;;  %v753_v42 = vpack.c.bf16 %v145_v38, %v138_v37  ;;  %v21_v48 = vsub.s32 0, %v20_v47 }
   0xe   :  { %683 = vmatprep.mubr.f32.mxu1 %v103_v39  ;;  %717 = vmatmul.mubr.f32.vlgmr.msra.gmra.mrb[0].mxu0 %v111_v27 }
   0xf   :  { %684 = vmatmul.mubr.f32.vlgmr.msra.gmra.mrb[0].mxu1 %v113_v40  ;;  %750 = vmatprep.subr.bf16.mxu1 %v749_v41  ;;  %v22_v50 = vrot.slane %v18_v49, %v21_v48 }
  0x10   :  { %752 = vmatpush3.bf16.msra.mxu1 %v749_v41  ;;  %776 = vmatpush3.bf16.msra.mxu0 %v773_v30 }
  0x11   :  { %754 = vmatprep.subr.bf16.mxu1 %v753_v42  ;;  %778 = vmatprep.subr.bf16.mxu0 %v777_v43 }
  0x12   :  { %694 = vmatprep.mubr.f32.mxu1 %v878_v13  ;;  %727 = vmatprep.mubr.f32.mxu0 %v878_v13 }
  0x14   :  { %756 = vmatpush3.bf16.msra.mxu1 %v753_v42  ;;  %780 = vmatpush3.bf16.msra.mxu0 %v777_v43 }
  0x15   :  { %758 = vmatprep.subr.bf16.mxu1 %v757_v44  ;;  %782 = vmatprep.subr.bf16.mxu0 %v741_v12 }
  0x17   :  { %695 = vmatmul.mubr.f32.vlgmr.msra.gmra.mrb[0].mxu1 %v880_v14  ;;  %728 = vmatmul.mubr.f32.vlgmr.msra.gmra.mrb[0].mxu0 %v880_v14 }
  0x18   :  { %760 = vmatpush3.bf16.msra.mxu1 %v757_v44  ;;  %784 = vmatpush3.bf16.msra.mxu0 %v741_v12 }
  0x19   :  { %762 = vmatprep.subr.bf16.mxu1 %v761_v45  ;;  %786 = vmatprep.subr.bf16.mxu0 %v745_v16 }
  0x1a   :  { %705 = vmatprep.mubr.f32.mxu1 %v100_v20  ;;  %738 = vmatprep.mubr.f32.mxu0 %v878_v13  ;;  %v587_v13 = vsub.s32 1, %v20_v47 }
  0x1c   :  { %764 = vmatpush3.bf16.msra.mxu1 %v761_v45  ;;  %788 = vmatpush3.bf16.msra.mxu0 %v745_v16  ;;  %v588_v15 = vrot.slane %v18_v49, %v587_v13 }
  0x1f   :  { %706 = vmatmul.mubr.f32.vlgmr.msra.gmra.mrb[0].mxu1 %v110_v21  ;;  %739 = vmatmul.mubr.f32.vlgmr.msra.gmra.mrb[0].mxu0 %v880_v14  ;;  %v593_v14 = vsub.s32 2, %v20_v47 }
  0x21   :  { %v594_v18 = vrot.slane %v18_v49, %v593_v14 }
  0xf2   :  { %v707_v51 = vpop.f32.mrb[0].mxu1  ;;  %v740_v52 = vpop.f32.mrb[0].mxu0 }
  0xf3   :  { %v789_v53 = vadd.f32 %v707_v51, %v22_v50  ;;  %v292_v54 = vpop.f32.mrb[1].mxu1  ;;  %v548_v55 = vpop.f32.mrb[1].mxu0 }
  0xf4   :  { %v791_v56 = vadd.f32 %v292_v54, %v22_v50 }
  0xf5   :  { %v790_v57 = vadd.f32 %v789_v53, %v740_v52 }
  0xf6   :  { %v792_v58 = vadd.f32 %v791_v56, %v548_v55 }
  0xf7   :  { %v561_v60 = vsel %vm23_vm0, %v790_v57, 0.0 }
  0xf8   :  { %v558_v59 = vsel %vm23_vm0, %v792_v58, 0.0 }
  0xf9   :  { %559 = vadd.xlane.f32.xlu0 %v558_v59 }
  0xfd   :  { %562 = vadd.xlane.f32.xlu0 %v561_v60 }
 0x186   :  { %v560_v61 = vpop.xlane.xlu0 %559 }
 0x187   :  { %v565_v62 = vmul.f32 0.03125, %v560_v61 }
 0x189   :  { %v567_v63 = vsub.f32 %v792_v58, %v565_v62 }
 0x18a   :  { %v563_v0 = vpop.xlane.xlu0 %562 }
 0x18b   :  { %v566_v1 = vmul.f32 0.03125, %v563_v0  ;;  %v569_v2 = vmul.f32 %v567_v63, %v567_v63 }
 0x18d   :  { %v568_v3 = vsub.f32 %v790_v57, %v566_v1  ;;  %v571_v4 = vsel %vm23_vm0, %v569_v2, 0.0 }
 0x18e   :  { %572 = vadd.xlane.f32.xlu1 %v571_v4 }
 0x18f   :  { %v570_v5 = vmul.f32 %v568_v3, %v568_v3 }
 0x191   :  { %v574_v6 = vsel %vm23_vm0, %v570_v5, 0.0 }
 0x192   :  { %575 = vadd.xlane.f32.xlu1 %v574_v6 }
 0x21b   :  { %v573_v7 = vpop.xlane.xlu1 %572 }
 0x21c   :  { %v577_v8 = vmul.f32 0.03125, %v573_v7 }
 0x21e   :  { %v579_v9 = vadd.f32 1e-05, %v577_v8 }
 0x21f   :  { %v576_v10 = vpop.xlane.xlu1 %575 }
 0x220   :  { %804 = vrsqrt.f32 %v579_v9  ;;  %v578_v11 = vmul.f32 0.03125, %v576_v10 }
 0x222   :  { %v580_v12 = vadd.f32 1e-05, %v578_v11 }
 0x224   :  { %806 = vrsqrt.f32 %v580_v12 }
 0x22a   :  { %v805_v16 = vpop.eup %804 }
 0x22b   :  { %v583_v17 = vmul.f32 %v805_v16, %v567_v63 }
 0x22d   :  { %v589_v19 = vmul.f32 %v588_v15, %v583_v17 }
 0x22e   :  { %v807_v20 = vpop.eup %806 }
 0x22f   :  { %v595_v21 = vadd.f32 %v594_v18, %v589_v19  ;;  %v584_v22 = vmul.f32 %v807_v20, %v568_v3 }
 0x231   :  { %v597_v23 = vsel %vm23_vm0, %v595_v21, -inf  ;;  %v590_v24 = vmul.f32 %v588_v15, %v584_v22 }
 0x232   :  { %598 = vmax.xlane.f32.xlu0 %v597_v23 }
 0x233   :  { %v596_v25 = vadd.f32 %v594_v18, %v590_v24 }
 0x235   :  { %v600_v26 = vsel %vm23_vm0, %v596_v25, -inf }
 0x236   :  { %601 = vmax.xlane.f32.xlu1 %v600_v26 }
 0x2bf   :  { %v599_v27 = vpop.xlane.xlu0 %598 }
 0x2c0   :  { %v603_v28 = vsub.f32 %v595_v21, %v599_v27 }
 0x2c2   :  { %v605_v29 = vmul.f32 1.442695, %v603_v28 }
 0x2c3   :  { %v602_v30 = vpop.xlane.xlu1 %601 }
 0x2c4   :  { %808 = vpow2.f32 %v605_v29  ;;  %v604_v31 = vsub.f32 %v596_v25, %v602_v30 }
 0x2c6   :  { %v607_v32 = vmul.f32 1.442695, %v604_v31 }
 0x2c8   :  { %810 = vpow2.f32 %v607_v32 }
 0x2ce   :  { %v809_v33 = vpop.eup %808 }
 0x2cf   :  { %v609_v34 = vsel %vm23_vm0, %v809_v33, 0.0 }
 0x2d0   :  { %610 = vadd.xlane.f32.xlu0 %v609_v34 }
 0x2d2   :  { %v811_v35 = vpop.eup %810 }
 0x2d3   :  { %v612_v36 = vsel %vm23_vm0, %v811_v35, 0.0 }
 0x2d4   :  { %613 = vadd.xlane.f32.xlu1 %v612_v36 }
 0x35d   :  { %v611_v37 = vpop.xlane.xlu0 %610 }
 0x35e   :  { %812 = vlog2.f32 %v611_v37 }
 0x361   :  { %v614_v38 = vpop.xlane.xlu1 %613 }
 0x362   :  { %814 = vlog2.f32 %v614_v38 }
 0x368   :  { %v813_v39 = vpop.eup %812 }
 0x369   :  { %v616_v40 = vmul.f32 0.6931472, %v813_v39 }
 0x36b   :  { %v619_v41 = vsub.f32 %v603_v28, %v616_v40 }
 0x36c   :  { %v815_v42 = vpop.eup %814 }
 0x36d   :  { %621 = vst.msk [vmem:[#allocation2] sm:$0xff] %vm23_vm0, %v619_v41  ;;  %v618_v43 = vmul.f32 0.6931472, %v815_v42 }
 0x36f   :  { %v620_v44 = vsub.f32 %v604_v31, %v618_v43 }
 0x371   :  { %622 = vst.msk [vmem:[#allocation2 + $0x8] sm:$0xff] %vm23_vm0, %v620_v44 }
 0x372   :  { %827 = shalt.err (!%p824_p4)
}
 0x373   :  { %s828_s26 = scalar_lea.hbm %s917_s2, 256 }
 0x374   :  { %p829_p5 = scmp.ne.s32.totalorder %s917_s2, %s828_s26  ;;  %p832_p6 = scmp.lt.u32.totalorder %s828_s26, %s917_s2 }
 0x376   :  { %p834_p7 = pnand %p832_p6, %p829_p5 }
 0x378   :  { %837 = shalt.err (!%p834_p7)
}
 0x379   :  { %s841_s3 = smov 128   ;;  %s842_s4 = smov 8  }
 0x37a   :  { %634 = dma.vmem_to_hbm [thread:$0]  %s629_s22, 256, %s917_s2, [#allocation3], %s841_s3, %s841_s3, %s842_s4  }
 0x37b   :  { %838 = dma.done.wait [#allocation3], 256  }
 0x37c   :  { %839 = vsyncadd [#allocation3], 4294967040 }
 0x37d   :  { %638 = vsyncpa [#allocation3], 1 }

</bundles_post_ra>
